<compile_context>
chip_gen: v6e
topology: v6e:2x2x1
jax: 0.10.0
libtpu: 0.0.40
codegen_flags: <defaults>
</compile_context>

<pallas_src>
import jax
import jax.numpy as jnp
from jax.experimental import pallas as pl
from jax.experimental.pallas import tpu as pltpu


def _round_up(x, m):
    return ((x + m - 1) // m) * m


def _mlp_kernel(x_ref, w_ref, b_ref, o_ref, acc_ref):
    """One (tm, tn) output tile; accumulates over the K grid axis."""
    k = pl.program_id(2)

    @pl.when(k == 0)
    def _init():
        acc_ref[...] = jnp.zeros_like(acc_ref)

    acc_ref[...] += jnp.dot(
        x_ref[...], w_ref[...], preferred_element_type=jnp.float32
    )

    @pl.when(k == pl.num_programs(2) - 1)
    def _finalize():
        y = acc_ref[...] + b_ref[...]          # f32 bias broadcast over batch
        o_ref[...] = jnp.maximum(y, 0.0).astype(o_ref.dtype)


def _tile_targets():
    """(tm, tn, tk, vmem_limit_bytes) sized per TPU generation."""
    try:
        kind = jax.devices()[0].device_kind.lower()
    except Exception:  # pragma: no cover - defensive
        kind = ""
    if ("v5" in kind) or ("v6" in kind):
        # 128 MiB physical VMEM: go big, raise scoped limit.
        return 512, 512, 512, 100 * 1024 * 1024
    # v7x / unknown: 64 MiB physical VMEM -> conservative tiles, explicit cap.
    return 256, 256, 512, 48 * 1024 * 1024


def one_layer_mlp(x, w_t, b, *, compute_dtype=jnp.bfloat16):
    """relu(x @ w_t + b).  x: (B, K), w_t: (K, N) (pre-transposed), b: (N,)."""
    B, K = x.shape
    Kw, N = w_t.shape
    assert K == Kw
    b = jnp.asarray(b, jnp.float32).reshape(1, N)
    out_dtype = x.dtype

    tm_t, tn_t, tk_t, vmem_limit = _tile_targets()

    # bf16 packs 16 rows per sublane group; f32 packs 8.
    sub = 16 if compute_dtype == jnp.bfloat16 else 8

    M_pad = _round_up(B, sub)
    tm = min(tm_t, M_pad)
    M_pad = _round_up(M_pad, tm)

    N_pad = _round_up(N, 128)
    tn = min(tn_t, N_pad)
    N_pad = _round_up(N_pad, tn)

    K_pad = _round_up(K, 128)
    tk = min(tk_t, K_pad)
    K_pad = _round_up(K_pad, tk)

    # Zero-pad to lane/sublane-dense, tile-divisible shapes.  Zero K/N padding
    # is inert for the matmul; padded rows/cols are sliced off below.
    xp = jnp.zeros((M_pad, K_pad), compute_dtype).at[:B, :K].set(
        x.astype(compute_dtype))
    wp = jnp.zeros((K_pad, N_pad), compute_dtype).at[:K, :N].set(
        w_t.astype(compute_dtype))
    bp = jnp.zeros((1, N_pad), jnp.float32).at[:, :N].set(b)

    grid = (M_pad // tm, N_pad // tn, K_pad // tk)

    isz = jnp.dtype(compute_dtype).itemsize
    cost = pl.CostEstimate(
        flops=2 * M_pad * K_pad * N_pad,
        transcendentals=0,
        bytes_accessed=(grid[1] * M_pad * K_pad * isz        # x re-read per N tile
                        + grid[0] * K_pad * N_pad * isz      # W re-read per M tile
                        + N_pad * 4                          # bias
                        + M_pad * N_pad * jnp.dtype(out_dtype).itemsize),
    )

    out = pl.pallas_call(
        _mlp_kernel,
        out_shape=jax.ShapeDtypeStruct((M_pad, N_pad), out_dtype),
        grid_spec=pltpu.PrefetchScalarGridSpec(
            num_scalar_prefetch=0,
            grid=grid,
            in_specs=[
                pl.BlockSpec((tm, tk), lambda i, j, k: (i, k)),
                pl.BlockSpec((tk, tn), lambda i, j, k: (k, j)),
                pl.BlockSpec((1, tn), lambda i, j, k: (0, j)),
            ],
            out_specs=pl.BlockSpec((tm, tn), lambda i, j, k: (i, j)),
            scratch_shapes=[pltpu.VMEM((tm, tn), jnp.float32)],
        ),
        compiler_params=pltpu.CompilerParams(
            dimension_semantics=("parallel", "parallel", "arbitrary"),
            vmem_limit_bytes=vmem_limit,
        ),
        cost_estimate=cost,
    )(xp, wp, bp)

    return out[:B, :N]


if __name__ == "__main__":
    # Small shapes consistent with the module's forward (single Linear layer).
    B, input_size, out_ch = 8, 32, 32

    key = jax.random.PRNGKey(0)
    kx, kw, kb = jax.random.split(key, 3)

    x = jax.random.normal(kx, (B, input_size), dtype=jnp.float32)
    # nn.Linear-style uniform(-1/sqrt(fan_in), 1/sqrt(fan_in)) init.
    bound = 1.0 / (input_size ** 0.5)
    w = jax.random.uniform(kw, (out_ch, input_size), minval=-bound, maxval=bound,
                           dtype=jnp.float32)          # PyTorch layout (out, in)
    b = jax.random.uniform(kb, (out_ch,), minval=-bound, maxval=bound,
                           dtype=jnp.float32)

    # Hoisted once at "init" time (not per forward): store W as (in, out).
    w_t = jnp.asarray(w.T)

    # f32 compute path: bit-for-bit comparable to the PyTorch forward.
    out_f32 = one_layer_mlp(x, w_t, b, compute_dtype=jnp.float32)
    jax.block_until_ready(out_f32)
    ref = jnp.maximum(x @ w.T + b, 0.0)
    assert jnp.allclose(out_f32, ref, atol=1e-5, rtol=1e-5), "f32 mismatch vs reference"

    # bf16-fed MXU path (f32 accumulation, f32 bias/ReLU epilogue).
    out_bf16 = one_layer_mlp(x, w_t, b, compute_dtype=jnp.bfloat16)
    jax.block_until_ready(out_bf16)
    ref_bf16 = jnp.maximum(
        x.astype(jnp.bfloat16).astype(jnp.float32)
        @ w_t.astype(jnp.bfloat16).astype(jnp.float32) + b, 0.0)
    assert jnp.allclose(out_bf16, ref_bf16, atol=1e-3, rtol=1e-3), "bf16 mismatch vs reference"

    print("KERNEL_OK")
</pallas_src>

<mosaic_0001>
module attributes {stable_mosaic.version = 11 : i64} {
  func.func @_mlp_kernel(%arg0: i32, %arg1: i32, %arg2: i32, %arg3: memref<8x128xf32, #tpu.memory_space<vmem>>, %arg4: memref<128x128xf32, #tpu.memory_space<vmem>>, %arg5: memref<1x128xf32, #tpu.memory_space<vmem>>, %arg6: memref<8x128xf32, #tpu.memory_space<vmem>>, %arg7: memref<8x128xf32, #tpu.memory_space<vmem>>) attributes {dimension_semantics = [#tpu.dimension_semantics<parallel>, #tpu.dimension_semantics<parallel>, #tpu.dimension_semantics<arbitrary>], iteration_bounds = array<i64: 1, 1, 1>, scalar_prefetch = 0 : i64, scratch_operands = 1 : i64, tpu.core_type = #tpu.core_type<tc>, window_params = [{transform_indices = @transform_0, window_bounds = array<i64: 8, 128>}, {transform_indices = @transform_1, window_bounds = array<i64: 128, 128>}, {transform_indices = @transform_2, window_bounds = array<i64: 1, 128>}, {transform_indices = @transform_3, window_bounds = array<i64: 8, 128>}]} {
    %c0_i32 = arith.constant 0 : i32
    %0 = arith.cmpi eq, %arg2, %c0_i32 : i32
    %1 = arith.extui %0 : i1 to i32
    %c0_i32_0 = arith.constant 0 : i32
    %2 = arith.cmpi ne, %1, %c0_i32_0 : i32
    scf.if %2 {
      %cst_10 = arith.constant 0.000000e+00 : f32
      %12 = vector.broadcast %cst_10 : f32 to vector<8x128xf32>
      %c0_11 = arith.constant 0 : index
      %c0_12 = arith.constant 0 : index
      %13 = vector.load %arg7[%c0_11, %c0_12] : memref<8x128xf32, #tpu.memory_space<vmem>>, vector<8x128xf32>
      tpu.vector_store %arg7[%c0_11, %c0_12], %12 {strides = array<i32>} : memref<8x128xf32, #tpu.memory_space<vmem>>, vector<8x128xf32>,
    } else {
    }
    %c0 = arith.constant 0 : index
    %c0_1 = arith.constant 0 : index
    %3 = vector.load %arg7[%c0, %c0_1] : memref<8x128xf32, #tpu.memory_space<vmem>>, vector<8x128xf32>
    %c0_2 = arith.constant 0 : index
    %c0_3 = arith.constant 0 : index
    %4 = vector.load %arg3[%c0_2, %c0_3] : memref<8x128xf32, #tpu.memory_space<vmem>>, vector<8x128xf32>
    %c0_4 = arith.constant 0 : index
    %c0_5 = arith.constant 0 : index
    %5 = vector.load %arg4[%c0_4, %c0_5] : memref<128x128xf32, #tpu.memory_space<vmem>>, vector<128x128xf32>
    %cst = arith.constant dense<0.000000e+00> : vector<8x128xf32>
    %6 = tpu.matmul %4, %5, %cst {dimension_numbers = #tpu.dot_dimension_numbers<[1], [0], [0], [1], [0, 0, 1, 1], [], []>} : vector<8x128xf32>, vector<128x128xf32>, vector<8x128xf32> -> vector<8x128xf32>
    %7 = arith.addf %3, %6 : vector<8x128xf32>
    %c0_6 = arith.constant 0 : index
    %c0_7 = arith.constant 0 : index
    %8 = vector.load %arg7[%c0_6, %c0_7] : memref<8x128xf32, #tpu.memory_space<vmem>>, vector<8x128xf32>
    tpu.vector_store %arg7[%c0_6, %c0_7], %7 {strides = array<i32>} : memref<8x128xf32, #tpu.memory_space<vmem>>, vector<8x128xf32>,
    %c0_i32_8 = arith.constant 0 : i32
    %9 = arith.cmpi eq, %arg2, %c0_i32_8 : i32
    %10 = arith.extui %9 : i1 to i32
    %c0_i32_9 = arith.constant 0 : i32
    %11 = arith.cmpi ne, %10, %c0_i32_9 : i32
    scf.if %11 {
      %c0_10 = arith.constant 0 : index
      %c0_11 = arith.constant 0 : index
      %12 = vector.load %arg7[%c0_10, %c0_11] : memref<8x128xf32, #tpu.memory_space<vmem>>, vector<8x128xf32>
      %c0_12 = arith.constant 0 : index
      %c0_13 = arith.constant 0 : index
      %13 = vector.load %arg5[%c0_12, %c0_13] : memref<1x128xf32, #tpu.memory_space<vmem>>, vector<1x128xf32>
      %14 = vector.broadcast %13 : vector<1x128xf32> to vector<8x128xf32>
      %15 = arith.addf %12, %14 : vector<8x128xf32>
      %cst_14 = arith.constant 0.000000e+00 : f32
      %16 = vector.broadcast %cst_14 : f32 to vector<8x128xf32>
      %17 = arith.maximumf %15, %16 : vector<8x128xf32>
      %c0_15 = arith.constant 0 : index
      %c0_16 = arith.constant 0 : index
      %18 = vector.load %arg6[%c0_15, %c0_16] : memref<8x128xf32, #tpu.memory_space<vmem>>, vector<8x128xf32>
      tpu.vector_store %arg6[%c0_15, %c0_16], %17 {strides = array<i32>} : memref<8x128xf32, #tpu.memory_space<vmem>>, vector<8x128xf32>,
    } else {
    }
    return
  }
  func.func @transform_0(%arg0: i32, %arg1: i32, %arg2: i32) -> (i32, i32) {
    %c0_i32 = arith.constant 0 : i32
    return %arg0, %arg2 : i32, i32
  }
  func.func @transform_1(%arg0: i32, %arg1: i32, %arg2: i32) -> (i32, i32) {
    %c0_i32 = arith.constant 0 : i32
    return %arg2, %arg1 : i32, i32
  }
  func.func @transform_2(%arg0: i32, %arg1: i32, %arg2: i32) -> (i32, i32) {
    %c0_i32 = arith.constant 0 : i32
    %c0_i32_0 = arith.constant 0 : i32
    return %c0_i32, %arg1 : i32, i32
  }
  func.func @transform_3(%arg0: i32, %arg1: i32, %arg2: i32) -> (i32, i32) {
    %c0_i32 = arith.constant 0 : i32
    return %arg0, %arg1 : i32, i32
  }
}

</mosaic_0001>

<bundles_post_ra>
// kernel: tpu_custom_call.1
= control target key start
LH: loop header
LB: loop body
LE: loop exit
PB: predicated region body
PF: predicated region fallthrough
CT: control target
= control target key end

     0   :  { %8 = vsyncpa [#allocation4], 0  ;;  %s331_s0 = inlined_call_operand.hbm [shape: f32[8,128], index: 0, kind: input, shape index: {}]   ;;  %s332_s1 = inlined_call_operand.hbm [shape: f32[128,128], index: 1, kind: input, shape index: {}]   ;;  %s333_s2 = inlined_call_operand.vmem [shape: f32[1,128], index: 2, kind: input, shape index: {}]   ;;  %s334_s3 = inlined_call_operand.hbm [shape: f32[8,128], index: 3, kind: output, shape index: {}]  }
   0x1   :  { %9 = vsyncpa [#allocation7], 0 }
   0x2   :  { %10 = vsyncpa [#allocation5], 0  ;;  %s292_s12 = smov [#allocation3]   ;;  %s293_s14 = smov [#allocation6]  }
   0x3   :  { %s17_s13 = sshll.u32 %s292_s12, 4  ;;  %s26_s15 = sshll.u32 %s293_s14, 4  ;;  %s18_s13 = int_to_ptr.vmem [resolvable:$true] %s17_s13  ;;  %s27_s15 = int_to_ptr.vmem [resolvable:$true] %s26_s15 }
   0x4   :  { %s234_s16 = scalar_lea.vmem %s18_s13, 128  ;;  %p239_p1 = scmp.lt.s32.totalorder %s18_s13, %s18_s13 }
   0x5   :  { %p235_p0 = scmp.ne.s32.totalorder %s18_s13, %s234_s16  ;;  %p240_p2 = scmp.lt.s32.totalorder %s234_s16, %s234_s16 }
   0x7   :  { %p241_p3 = por %p240_p2, %p239_p1 }
   0x9   :  { %p242_p4 = pnand %p241_p3, %p235_p0 }
   0xb   :  { %245 = shalt.err (!%p242_p4)
}
   0xc   :  { %20 = dma.hbm_to_vmem [thread:$0]  %s331_s0, 128, %s18_s13, [#allocation4]  }
   0xd   :  { %s254_s19 = scalar_lea.vmem %s27_s15, 2048  ;;  %p259_p6 = scmp.lt.s32.totalorder %s27_s15, %s27_s15 }
   0xe   :  { %p255_p5 = scmp.ne.s32.totalorder %s27_s15, %s254_s19  ;;  %p260_p7 = scmp.lt.s32.totalorder %s254_s19, %s254_s19 }
  0x10   :  { %p261_p8 = por %p260_p7, %p259_p6 }
  0x12   :  { %p262_p9 = pnand %p261_p8, %p255_p5 }
  0x14   :  { %265 = shalt.err (!%p262_p9)
}
  0x15   :  { %s294_s20 = smov 128   ;;  %s295_s21 = smov 8  }
  0x16   :  { %32 = dma.hbm_to_vmem [thread:$0]  %s332_s1, 2048, %s27_s15, [#allocation7], %s294_s20, %s294_s20, %s295_s21  }
  0x17   :  { %286 = dma.done.wait [#allocation4], 128  }
  0x18   :  { %287 = vsyncadd [#allocation4], 4294967168 }
  0x19   :  { %288 = dma.done.wait [#allocation7], 2048  }
  0x1a   :  { %289 = vsyncadd [#allocation7], 4294965248  ;;  %v296_v0 = vmov 0.0   ;;  %vm297_vm0 = vmmov 0   ;;  %v63_v1 = vld [vmem:[#allocation6 + $0x78] sm:$0xff]  ;;  %v62_v2 = vld [vmem:[#allocation6 + $0x70] sm:$0xff] }
  0x1b   :  { %184 = vmatprep.subr.mxu0 %v296_v0  ;;  %216 = vmatprep.mubr.msk.f32.mxu0 %vm297_vm0, %v296_v0  ;;  %v61_v3 = vld [vmem:[#allocation6 + $0x68] sm:$0xff]  ;;  %v60_v4 = vld [vmem:[#allocation6 + $0x60] sm:$0xff]  ;;  %v59_v5 = vld [vmem:[#allocation6 + $0x58] sm:$0xff]  ;;  %s298_s24 = smov [#allocation8]  }
  0x1c   :  { %185 = vmatpush3.msra.mxu0 %v63_v1  ;;  %v58_v6 = vld [vmem:[#allocation6 + $0x50] sm:$0xff]  ;;  %v57_v7 = vld [vmem:[#allocation6 + $0x48] sm:$0xff]  ;;  %v56_v8 = vld [vmem:[#allocation6 + $0x40] sm:$0xff]  ;;  %s156_s25 = sshll.u32 %s298_s24, 4  ;;  %s157_s25 = int_to_ptr.vmem [resolvable:$true] %s156_s25 }
  0x1d   :  { %186 = vmatprep.subr.mxu0 %v296_v0  ;;  %v55_v9 = vld [vmem:[#allocation6 + $0x38] sm:$0xff]  ;;  %v54_v10 = vld [vmem:[#allocation6 + $0x30] sm:$0xff]  ;;  %v53_v11 = vld [vmem:[#allocation6 + $0x28] sm:$0xff]  ;;  %s266_s26 = scalar_lea.vmem %s157_s25, 128  ;;  %p271_p11 = scmp.lt.s32.totalorder %s157_s25, %s157_s25 }
  0x1e   :  { %187 = vmatpush3.msra.mxu0 %v62_v2  ;;  %v52_v12 = vld [vmem:[#allocation6 + $0x20] sm:$0xff]  ;;  %v51_v13 = vld [vmem:[#allocation6 + $0x18] sm:$0xff]  ;;  %v50_v14 = vld [vmem:[#allocation6 + $0x10] sm:$0xff]  ;;  %p267_p10 = scmp.ne.s32.totalorder %s157_s25, %s266_s26  ;;  %p272_p12 = scmp.lt.s32.totalorder %s266_s26, %s266_s26 }
  0x1f   :  { %188 = vmatprep.subr.mxu0 %v296_v0  ;;  %v49_v15 = vld [vmem:[#allocation6 + $0x8] sm:$0xff]  ;;  %v48_v16 = vld [vmem:[#allocation6] sm:$0xff]  ;;  %v47_v17 = vld [vmem:[#allocation3] sm:$0xff] }
  0x20   :  { %189 = vmatpush3.msra.mxu0 %v61_v3  ;;  %v166_v18 = vld [vmem:[%s333_s2] ss:$0 sm:$0xff]  ;;  %p273_p13 = por %p272_p12, %p271_p11 }
  0x21   :  { %190 = vmatprep.subr.mxu0 %v296_v0 }
  0x22   :  { %191 = vmatpush3.msra.mxu0 %v60_v4  ;;  %p274_p0 = pnand %p273_p13, %p267_p10 }
  0x23   :  { %192 = vmatprep.subr.mxu0 %v296_v0 }
  0x24   :  { %193 = vmatpush3.msra.mxu0 %v59_v5 }
  0x25   :  { %194 = vmatprep.subr.mxu0 %v296_v0 }
  0x26   :  { %195 = vmatpush3.msra.mxu0 %v58_v6 }
  0x27   :  { %196 = vmatprep.subr.mxu0 %v296_v0 }
  0x28   :  { %197 = vmatpush3.msra.mxu0 %v57_v7 }
  0x29   :  { %198 = vmatprep.subr.mxu0 %v296_v0 }
  0x2a   :  { %199 = vmatpush3.msra.mxu0 %v56_v8 }
  0x2b   :  { %200 = vmatprep.subr.mxu0 %v296_v0 }
  0x2c   :  { %201 = vmatpush3.msra.mxu0 %v55_v9 }
  0x2d   :  { %202 = vmatprep.subr.mxu0 %v296_v0 }
  0x2e   :  { %203 = vmatpush3.msra.mxu0 %v54_v10 }
  0x2f   :  { %204 = vmatprep.subr.mxu0 %v296_v0 }
  0x30   :  { %205 = vmatpush3.msra.mxu0 %v53_v11 }
  0x31   :  { %206 = vmatprep.subr.mxu0 %v296_v0 }
  0x32   :  { %207 = vmatpush3.msra.mxu0 %v52_v12 }
  0x33   :  { %208 = vmatprep.subr.mxu0 %v296_v0 }
  0x34   :  { %209 = vmatpush3.msra.mxu0 %v51_v13 }
  0x35   :  { %210 = vmatprep.subr.mxu0 %v296_v0 }
  0x36   :  { %211 = vmatpush3.msra.mxu0 %v50_v14 }
  0x37   :  { %212 = vmatprep.subr.mxu0 %v296_v0 }
  0x38   :  { %213 = vmatpush3.msra.mxu0 %v49_v15 }
  0x39   :  { %214 = vmatprep.subr.mxu0 %v296_v0 }
  0x3a   :  { %215 = vmatpush3.msra.mxu0 %v48_v16 }
  0x3b   :  { %217 = vmatmul.mubr.f32.vlgmr.msra.gmra.mxu0 %v47_v17 }
  0xfb   :  { %v130_v19 = vpop.f32.mrf.mxu0 }
  0xfc   :  { %v147_v20 = vadd.f32 %v166_v18, %v130_v19 }
  0xfd   :  { %v218_v21 = vpop.f32.mrf.mxu0 }
  0xfe   :  { %v148_v22 = vmax.f32 %v147_v20, 0.0 }
 0x100   :  { %149 = vst [vmem:[#allocation8] sm:$0xff] %v148_v22 }
 0x101   :  { %277 = shalt.err (!%p274_p0)
}
 0x102   :  { %159 = dma.vmem_to_hbm [thread:$0]  %s157_s25, 128, %s334_s3, [#allocation5]  }
 0x103   :  { %290 = dma.done.wait [#allocation5], 128  }
 0x104   :  { %291 = vsyncadd [#allocation5], 4294967168 }
 0x105   :  { %163 = vsyncpa [#allocation4], 1 }
 0x106   :  { %164 = vsyncpa [#allocation7], 1 }
 0x107   :  { %165 = vsyncpa [#allocation5], 1 }

</bundles_post_ra>
